<compile_context>
chip_gen: v5e
topology: v5e:2x2
jax: 0.10.0
libtpu: 0.0.40
codegen_flags: <defaults>
</compile_context>

<pallas_src>
import jax
import jax.numpy as jnp
from jax import lax
from jax.experimental import pallas as pl
from jax.experimental.pallas import tpu as pltpu


def mlp_kernel(x_ref, w1T_ref, b1_ref, w2T_ref, b2_ref, w3T_ref, b3_ref, oT_ref):
    # x tile in native layout: (TB, 10).  Fold the transpose into the matmul:
    # (16, 10) x (TB, 10), contracting dim 1 of both -> (16, TB).
    h1 = lax.dot_general(
        w1T_ref[...], x_ref[...],
        dimension_numbers=(((1,), (1,)), ((), ())),
        preferred_element_type=jnp.float32,
    ) + b1_ref[...]
    h1 = jnp.maximum(h1, 0.0)

    # fc2 + relu : (8, 16) @ (16, TB) -> (8, TB)
    h2 = jnp.dot(w2T_ref[...], h1, preferred_element_type=jnp.float32) + b2_ref[...]
    h2 = jnp.maximum(h2, 0.0)

    # fc3 + sigmoid : (1, 8) @ (8, TB) -> (1, TB); lane-dense output store.
    h3 = jnp.dot(w3T_ref[...], h2, preferred_element_type=jnp.float32) + b3_ref[...]
    oT_ref[...] = jax.nn.sigmoid(h3)


def _round_up(n, m):
    return ((n + m - 1) // m) * m


def mlp_forward(x, params, tb=16384):
    """x: (B, 10) float32.  Returns (B, 1) float32, matching the PyTorch module."""
    w1, b1, w2, b2, w3, b3 = params
    x = x.astype(jnp.float32)
    B, F = x.shape

    # ---- batch tile selection --------------------------------------------------
    # TB is the lane extent of the output tile -> must be a multiple of 128.
    # Cap at 32K so double-buffered tiles fit v7x's 64 MiB physical VMEM.
    tb = int(max(128, min(tb, 32768)))
    if B <= 128:
        TB = 128
    else:
        # >= 2 grid steps whenever there is more than one tile of work, so the
        # "parallel" batch axis shards across v7x's two TensorCores.
        nsteps = max(2, pl.cdiv(B, tb))
        TB = min(tb, _round_up(pl.cdiv(B, nsteps), 128))
    PB = _round_up(B, TB)
    grid = (PB // TB,)

    if PB != B:  # pad the ragged tail once; sliced off the output below
        x = jnp.pad(x, ((0, PB - B), (0, 0)))

    # ---- parameters in (out_features, in_features) / column form ---------------
    w1T = w1.T.astype(jnp.float32)                 # (16, 10)
    w2T = w2.T.astype(jnp.float32)                 # (8, 16)
    w3T = w3.T.astype(jnp.float32)                 # (1, 8)
    b1c = b1.reshape(-1, 1).astype(jnp.float32)    # (16, 1) — broadcasts over lanes
    b2c = b2.reshape(-1, 1).astype(jnp.float32)    # (8, 1)
    b3c = b3.reshape(-1, 1).astype(jnp.float32)    # (1, 1)

    # Double-buffered VMEM per step: x tile (TB,10) pads lanes 10->128
    # (512*TB B per buffer); out tile (1,TB) pads sublanes 1->8 (32*TB B per
    # buffer); weights/biases < 64 KiB.  Raise the scoped limit (v5e default is
    # only 16 MiB) but stay well under v7x's 64 MiB physical VMEM.
    vmem_bytes = 2 * 512 * TB + 2 * 32 * TB + (1 << 20)
    vmem_limit = int(min(48 << 20, max(32 << 20, vmem_bytes + (8 << 20))))

    const_spec = lambda shape: pl.BlockSpec(shape, lambda i: (0, 0))  # VMEM-resident

    oT = pl.pallas_call(
        mlp_kernel,
        out_shape=jax.ShapeDtypeStruct((1, PB), jnp.float32),
        grid=grid,
        in_specs=[
            pl.BlockSpec((TB, 10), lambda i: (i, 0)),        # x, native layout
            const_spec(w1T.shape), const_spec(b1c.shape),
            const_spec(w2T.shape), const_spec(b2c.shape),
            const_spec(w3T.shape), const_spec(b3c.shape),
        ],
        out_specs=pl.BlockSpec((1, TB), lambda i: (0, i)),   # lane-dense output tile
        compiler_params=pltpu.CompilerParams(
            dimension_semantics=("parallel",),               # independent batch tiles
            vmem_limit_bytes=vmem_limit,
        ),
    )(x, w1T, b1c, w2T, b2c, w3T, b3c)

    return oT[0, :B].reshape(B, 1)


def init_params(key):
    # Mimic PyTorch nn.Linear default init: U(-1/sqrt(fan_in), 1/sqrt(fan_in)).
    dims = [(10, 16), (16, 8), (8, 1)]
    params = []
    for fan_in, fan_out in dims:
        kw, kb, key = jax.random.split(key, 3)
        bound = 1.0 / (fan_in ** 0.5)
        params.append(jax.random.uniform(kw, (fan_in, fan_out), jnp.float32, -bound, bound))
        params.append(jax.random.uniform(kb, (fan_out,), jnp.float32, -bound, bound))
    return tuple(params)


def reference_forward(x, params):
    w1, b1, w2, b2, w3, b3 = params
    h = jnp.maximum(x @ w1 + b1, 0.0)
    h = jnp.maximum(h @ w2 + b2, 0.0)
    return jax.nn.sigmoid(h @ w3 + b3)


if __name__ == "__main__":
    key = jax.random.PRNGKey(0)
    kx, kp = jax.random.split(key)
    params = init_params(kp)

    # Small batch, big enough to exercise a 2-step "parallel" grid (TB = 128).
    B = 256
    x = jax.random.normal(kx, (B, 10), jnp.float32)
    out = jax.block_until_ready(mlp_forward(x, params))
    ref = reference_forward(x, params)
    assert out.shape == (B, 1), out.shape
    assert jnp.allclose(out, ref, atol=2e-5, rtol=1e-5), "mismatch vs pure-JAX reference"

    # Tiny ragged batch -> exercises the wrapper-side padding + output slice path.
    xs = jax.random.normal(kx, (8, 10), jnp.float32)
    outs = jax.block_until_ready(mlp_forward(xs, params))
    assert outs.shape == (8, 1)
    assert jnp.allclose(outs, reference_forward(xs, params), atol=2e-5, rtol=1e-5)

    print("KERNEL_OK")
</pallas_src>

<mosaic_0001>
module attributes {stable_mosaic.version = 11 : i64} {
  func.func @mlp_kernel(%arg0: i32, %arg1: memref<128x10xf32, #tpu.memory_space<vmem>>, %arg2: memref<16x10xf32, #tpu.memory_space<vmem>>, %arg3: memref<16x1xf32, #tpu.memory_space<vmem>>, %arg4: memref<8x16xf32, #tpu.memory_space<vmem>>, %arg5: memref<8x1xf32, #tpu.memory_space<vmem>>, %arg6: memref<1x8xf32, #tpu.memory_space<vmem>>, %arg7: memref<1x1xf32, #tpu.memory_space<vmem>>, %arg8: memref<1x128xf32, #tpu.memory_space<vmem>>) attributes {dimension_semantics = [#tpu.dimension_semantics<parallel>], iteration_bounds = array<i64: 2>, scalar_prefetch = 0 : i64, scratch_operands = 0 : i64, tpu.core_type = #tpu.core_type<tc>, window_params = [{transform_indices = @transform_0, window_bounds = array<i64: 128, 10>}, {pipeline_mode = #tpu.pipeline_mode<synchronous>, transform_indices = @transform_1, window_bounds = array<i64: 16, 10>}, {pipeline_mode = #tpu.pipeline_mode<synchronous>, transform_indices = @transform_2, window_bounds = array<i64: 16, 1>}, {pipeline_mode = #tpu.pipeline_mode<synchronous>, transform_indices = @transform_3, window_bounds = array<i64: 8, 16>}, {pipeline_mode = #tpu.pipeline_mode<synchronous>, transform_indices = @transform_4, window_bounds = array<i64: 8, 1>}, {pipeline_mode = #tpu.pipeline_mode<synchronous>, transform_indices = @transform_5, window_bounds = array<i64: 1, 8>}, {pipeline_mode = #tpu.pipeline_mode<synchronous>, transform_indices = @transform_6, window_bounds = array<i64: 1, 1>}, {transform_indices = @transform_7, window_bounds = array<i64: 1, 128>}]} {
    %c0 = arith.constant 0 : index
    %c0_0 = arith.constant 0 : index
    %0 = vector.load %arg2[%c0, %c0_0] : memref<16x10xf32, #tpu.memory_space<vmem>>, vector<16x10xf32>
    %c0_1 = arith.constant 0 : index
    %c0_2 = arith.constant 0 : index
    %1 = vector.load %arg1[%c0_1, %c0_2] : memref<128x10xf32, #tpu.memory_space<vmem>>, vector<128x10xf32>
    %cst = arith.constant dense<0.000000e+00> : vector<16x128xf32>
    %2 = tpu.matmul %0, %1, %cst {dimension_numbers = #tpu.dot_dimension_numbers<[1], [1], [0], [0], [0, 0, 1, 0], [], []>} : vector<16x10xf32>, vector<128x10xf32>, vector<16x128xf32> -> vector<16x128xf32>
    %c0_3 = arith.constant 0 : index
    %c0_4 = arith.constant 0 : index
    %3 = vector.load %arg3[%c0_3, %c0_4] : memref<16x1xf32, #tpu.memory_space<vmem>>, vector<16x1xf32>
    %4 = vector.broadcast %3 : vector<16x1xf32> to vector<16x128xf32>
    %5 = arith.addf %2, %4 : vector<16x128xf32>
    %cst_5 = arith.constant 0.000000e+00 : f32
    %6 = vector.broadcast %cst_5 : f32 to vector<16x128xf32>
    %7 = arith.maximumf %5, %6 : vector<16x128xf32>
    %c0_6 = arith.constant 0 : index
    %c0_7 = arith.constant 0 : index
    %8 = vector.load %arg4[%c0_6, %c0_7] : memref<8x16xf32, #tpu.memory_space<vmem>>, vector<8x16xf32>
    %cst_8 = arith.constant dense<0.000000e+00> : vector<8x128xf32>
    %9 = tpu.matmul %8, %7, %cst_8 {dimension_numbers = #tpu.dot_dimension_numbers<[1], [0], [0], [1], [0, 0, 1, 1], [], []>} : vector<8x16xf32>, vector<16x128xf32>, vector<8x128xf32> -> vector<8x128xf32>
    %c0_9 = arith.constant 0 : index
    %c0_10 = arith.constant 0 : index
    %10 = vector.load %arg5[%c0_9, %c0_10] : memref<8x1xf32, #tpu.memory_space<vmem>>, vector<8x1xf32>
    %11 = vector.broadcast %10 : vector<8x1xf32> to vector<8x128xf32>
    %12 = arith.addf %9, %11 : vector<8x128xf32>
    %cst_11 = arith.constant 0.000000e+00 : f32
    %13 = vector.broadcast %cst_11 : f32 to vector<8x128xf32>
    %14 = arith.maximumf %12, %13 : vector<8x128xf32>
    %c0_12 = arith.constant 0 : index
    %c0_13 = arith.constant 0 : index
    %15 = vector.load %arg6[%c0_12, %c0_13] : memref<1x8xf32, #tpu.memory_space<vmem>>, vector<1x8xf32>
    %cst_14 = arith.constant dense<0.000000e+00> : vector<1x128xf32>
    %16 = tpu.matmul %15, %14, %cst_14 {dimension_numbers = #tpu.dot_dimension_numbers<[1], [0], [0], [1], [0, 0, 1, 1], [], []>} : vector<1x8xf32>, vector<8x128xf32>, vector<1x128xf32> -> vector<1x128xf32>
    %c0_15 = arith.constant 0 : index
    %c0_16 = arith.constant 0 : index
    %17 = vector.load %arg7[%c0_15, %c0_16] : memref<1x1xf32, #tpu.memory_space<vmem>>, vector<1x1xf32>
    %18 = vector.broadcast %17 : vector<1x1xf32> to vector<1x128xf32>
    %19 = arith.addf %16, %18 : vector<1x128xf32>
    %20 = arith.negf %19 : vector<1x128xf32>
    %21 = math.exp %20 : vector<1x128xf32>
    %cst_17 = arith.constant 1.000000e+00 : f32
    %22 = vector.broadcast %cst_17 : f32 to vector<1x128xf32>
    %23 = arith.addf %22, %21 : vector<1x128xf32>
    %24 = arith.divf %22, %23 : vector<1x128xf32>
    %c0_18 = arith.constant 0 : index
    %c0_19 = arith.constant 0 : index
    %25 = vector.load %arg8[%c0_18, %c0_19] : memref<1x128xf32, #tpu.memory_space<vmem>>, vector<1x128xf32>
    tpu.vector_store %arg8[%c0_18, %c0_19], %24 {strides = array<i32>} : memref<1x128xf32, #tpu.memory_space<vmem>>, vector<1x128xf32>,
    return
  }
  func.func @transform_0(%arg0: i32) -> (i32, i32) {
    %c0_i32 = arith.constant 0 : i32
    %c0_i32_0 = arith.constant 0 : i32
    return %arg0, %c0_i32 : i32, i32
  }
  func.func @transform_1(%arg0: i32) -> (i32, i32) {
    %c0_i32 = arith.constant 0 : i32
    %c0_i32_0 = arith.constant 0 : i32
    %c0_i32_1 = arith.constant 0 : i32
    return %c0_i32, %c0_i32_0 : i32, i32
  }
  func.func @transform_2(%arg0: i32) -> (i32, i32) {
    %c0_i32 = arith.constant 0 : i32
    %c0_i32_0 = arith.constant 0 : i32
    %c0_i32_1 = arith.constant 0 : i32
    return %c0_i32, %c0_i32_0 : i32, i32
  }
  func.func @transform_3(%arg0: i32) -> (i32, i32) {
    %c0_i32 = arith.constant 0 : i32
    %c0_i32_0 = arith.constant 0 : i32
    %c0_i32_1 = arith.constant 0 : i32
    return %c0_i32, %c0_i32_0 : i32, i32
  }
  func.func @transform_4(%arg0: i32) -> (i32, i32) {
    %c0_i32 = arith.constant 0 : i32
    %c0_i32_0 = arith.constant 0 : i32
    %c0_i32_1 = arith.constant 0 : i32
    return %c0_i32, %c0_i32_0 : i32, i32
  }
  func.func @transform_5(%arg0: i32) -> (i32, i32) {
    %c0_i32 = arith.constant 0 : i32
    %c0_i32_0 = arith.constant 0 : i32
    %c0_i32_1 = arith.constant 0 : i32
    return %c0_i32, %c0_i32_0 : i32, i32
  }
  func.func @transform_6(%arg0: i32) -> (i32, i32) {
    %c0_i32 = arith.constant 0 : i32
    %c0_i32_0 = arith.constant 0 : i32
    %c0_i32_1 = arith.constant 0 : i32
    return %c0_i32, %c0_i32_0 : i32, i32
  }
  func.func @transform_7(%arg0: i32) -> (i32, i32) {
    %c0_i32 = arith.constant 0 : i32
    %c0_i32_0 = arith.constant 0 : i32
    return %c0_i32, %arg0 : i32, i32
  }
}

</mosaic_0001>

<bundles_post_ra>
// kernel: tpu_custom_call.1
= control target key start
LH: loop header
LB: loop body
LE: loop exit
PB: predicated region body
PF: predicated region fallthrough
CT: control target
= control target key end

     0   :  { %s898_s0 = inlined_call_operand.vmem [shape: f32[256,10], index: 0, kind: input, shape index: {}]   ;;  %s899_s1 = inlined_call_operand.vmem [shape: f32[16,10], index: 1, kind: input, shape index: {}]   ;;  %s900_s2 = inlined_call_operand.vmem [shape: f32[16,1], index: 2, kind: input, shape index: {}]   ;;  %s901_s3 = inlined_call_operand.vmem [shape: f32[8,16], index: 3, kind: input, shape index: {}]   ;;  %s902_s4 = inlined_call_operand.vmem [shape: f32[8,1], index: 4, kind: input, shape index: {}]   ;;  %s903_s5 = inlined_call_operand.vmem [shape: f32[1,8], index: 5, kind: input, shape index: {}]   ;;  %s904_s6 = inlined_call_operand.<no memory space> [shape: f32[1,1], index: 6, kind: input, shape index: {}]   ;;  %s905_s7 = inlined_call_operand.hbm [shape: f32[1,256], index: 7, kind: output, shape index: {}]  }
   0x1   :  { %v12_v0 = vstv %s904_s6 }
   0x2   :  { %13 = vst [vmem:[#allocation2] sm:$0x1] %v12_v0 }
   0x3   :  { %14 = vsyncpa [#allocation4], 0 }
   0x4   :  { %16 = vsyncpa [#allocation4 + $0x1], 0  ;;  %s741_s26 = smov 0   ;;  %s743_s27 = smov 0  }
   0x5   :  { %s745_s28 = smov 0   ;;  %s747_s29 = smov 0  }
   0x6 LB: > { %s762_s6 = sadd.s32 4294967295, %s695_s29   ;;  %s542_s30 = sadd.s32 4294967294, %s695_s29   ;;  %s695_s29 = sphi %s747_s29, %s911_s29   ;;  %s691_s28 = sphi %s745_s28, %s910_s28   ;;  %s687_s27 = sphi %s743_s27, %s909_s27   ;;  %s683_s26 = sphi %s741_s26, %s908_s26  }
   0x7   : > { %s766_s8 = sadd.s32 1, %s695_s29   ;;  %s181_s9 = sadd.s32 1, %s691_s28 }
   0x8   : > { %s178_s10 = ssub.s32 %s695_s29, %s766_s8  ;;  %p191_p0 = scmp.ne.s32.totalorder %s691_s28, %s687_s27 }
   0x9   : > { %p179_p1 = scmp.eq.s32.totalorder %s178_s10, 0  ;;  %p192_p2 = scmp.eq.s32.totalorder %s762_s6, 1 }
   0xa   : > { %p197_p3 = scmp.ne.s32.totalorder %s687_s27, %s683_s26  ;;  %p198_p4 = scmp.eq.s32.totalorder %s542_s30, 1 }
   0xb   : > { %s777_s11 = scalar_select %p179_p1, %s691_s28, %s181_s9  }
   0xc   : > { %p779_p5 = por %p192_p2, %p191_p0  ;;  %p783_p6 = por %p198_p4, %p197_p3 }
   0xd   : > { %p545_p7 = scmp.ge.s32.totalorder %s695_s29, 1  ;;  %p243_p8 = scmp.lt.s32.totalorder %s695_s29, 3 }
   0xf   : > { %p244_p9 = pnand %p545_p7, %p243_p8 }
  0x10   : > { %s546_s14 = sshll.u32 (!%p244_p9), %s762_s6, 4  ;;  %s483_s21 = scalar_lea.hbm (!%p244_p9), %s905_s7, %s762_s6 }
  0x11   : > { %247 = sbr.rel (%p244_p9) target bundleno = 524 (0x20c), region = 48  ;;  %p275_p10 = scmp.lt.s32.totalorder (!%p244_p9), %s546_s14, 31 }
  0x12   : > { %s487_s24 = sshll.u32 (!%p244_p9), %s483_s21, 4  ;;  %s488_s24 = int_to_ptr.hbm [resolvable:$true] %s487_s24 }
  0x13   : > { %s647_s6 = sshra.s32 (!%p244_p9), %s488_s24, 4  ;;  %s648_s6 = int_to_ptr.hbm [resolvable:$true] %s647_s6 }
  0x14   : > { %s649_s30 = scalar_lea.hbm (!%p244_p9), %s648_s6, 1  ;;  %p654_p0 = scmp.lt.s32.totalorder (!%p244_p9), %s648_s6, %s905_s7 }
  0x15   : > { %p650_p11 = scmp.ne.s32.totalorder (!%p244_p9), %s648_s6, %s649_s30 }
  0x16   : > { %s913_s14 = smov (!%p275_p10, %s546_s14), 31  ;;  %vm310_vm0 = vcmask 80896   ;;  %v299_v10 = vld [vmem:[%s900_s2 + $0x8] sm:$0xff]  ;;  %v697_v12 = vmov 0   ;;  %v298_v14 = vld [vmem:[%s900_s2] sm:$0xff]  ;;  %vm397_vm1 = vcmask 130048  }
  0x17   : > { %s547_s15 = sshll.u32 %s913_s14, 3  ;;  %627 = vset.pattern.permute.xlu0 %v697_v12  ;;  %628 = vset.pattern.permute.xlu1 %v697_v12  ;;  %v280_v20 = vld [vmem:[%s899_s1] sm:$0xff]  ;;  %v281_v21 = vld [vmem:[%s899_s1 + $0x8] sm:$0xff]  ;;  %vm430_vm2 = vcmask 64512   ;;  %p651_p12 = pnand %p650_p11, %p779_p5 }
  0x18   : > { %s793_s18 = scalar_lea.vmem %s898_s0, %s547_s15  ;;  %307 = vperm.xlu0 %627, %v299_v10   ;;  %v391_v22 = vld [vmem:[%s902_s4] sm:$0xff]  ;;  %s653_s14 = scalar_lea.hbm %s905_s7, 2 }
  0x19   : > { %v297_v1 = vld [vmem:[%s793_s18 + $0x78] sm:$0xff]  ;;  %v296_v2 = vld [vmem:[%s793_s18 + $0x70] sm:$0xff]  ;;  %v295_v3 = vld [vmem:[%s793_s18 + $0x68] sm:$0xff]  ;;  %394 = vperm.xlu1 %628, %v391_v22   ;;  %p652_p13 = pneg %p651_p12  ;;  %p655_p1 = scmp.lt.s32.totalorder %s653_s14, %s649_s30 }
  0x1a   : > { %548 = vmatpush.xpose.msk.msra.mxu0 %vm310_vm0, %v297_v1  ;;  %571 = vmatpush.xpose.msk.msra.mxu3 %vm310_vm0, %v297_v1  ;;  %v294_v4 = vld [vmem:[%s793_s18 + $0x60] sm:$0xff]  ;;  %v293_v5 = vld [vmem:[%s793_s18 + $0x58] sm:$0xff]  ;;  %v292_v6 = vld [vmem:[%s793_s18 + $0x50] sm:$0xff] }
  0x1b   : > { %v291_v7 = vld [vmem:[%s793_s18 + $0x48] sm:$0xff]  ;;  %v290_v8 = vld [vmem:[%s793_s18 + $0x40] sm:$0xff]  ;;  %v289_v9 = vld [vmem:[%s793_s18 + $0x38] sm:$0xff]  ;;  %p656_p2 = por %p655_p1, %p654_p0 }
  0x1c   : > { %v288_v11 = vld [vmem:[%s793_s18 + $0x30] sm:$0xff]  ;;  %v287_v13 = vld [vmem:[%s793_s18 + $0x28] sm:$0xff]  ;;  %v286_v15 = vld [vmem:[%s793_s18 + $0x20] sm:$0xff] }
  0x1d   : > { %v285_v16 = vld [vmem:[%s793_s18 + $0x18] sm:$0xff]  ;;  %v284_v17 = vld [vmem:[%s793_s18 + $0x10] sm:$0xff]  ;;  %v283_v18 = vld [vmem:[%s793_s18 + $0x8] sm:$0xff]  ;;  %p657_p3 = pnand %p656_p2, %p652_p13 }
  0x1e   : > { %549 = vmatpush.xpose.msk.msra.mxu0 %vm310_vm0, %v296_v2  ;;  %572 = vmatpush.xpose.msk.msra.mxu3 %vm310_vm0, %v296_v2  ;;  %v282_v19 = vld [vmem:[%s793_s18] sm:$0xff]  ;;  %s272_s18 = sand.u32 1, %s687_s27  }
  0x1f   : > { %v423_v23 = vld [vmem:[#allocation2] sm:$0x1]  ;;  %s273_s22 = scalar_lea.vmem [#allocation3], %s272_s18  ;;  %s475_s25 = scalar_lea.sflag [#allocation4], %s272_s18 }
  0x20   : > { %302 = vperm.xlu0 %627, %v298_v14   ;;  %v390_v32 = vld [vmem:[%s901_s3] sm:$0xff]  ;;  %s485_s23 = sshll.u32 %s273_s22, 4  ;;  %s486_s23 = int_to_ptr.vmem [resolvable:$true] %s485_s23 }
  0x21   : > { %426 = vperm.xlu1 %628, %v423_v23   ;;  %v422_v37 = vld [vmem:[%s903_s5] sm:$0x1] }
  0x22   : > { %550 = vmatpush.xpose.msk.msra.mxu0 %vm310_vm0, %v295_v3  ;;  %573 = vmatpush.xpose.msk.msra.mxu3 %vm310_vm0, %v295_v3 }
  0x26   : > { %551 = vmatpush.xpose.msk.msra.mxu0 %vm310_vm0, %v294_v4  ;;  %574 = vmatpush.xpose.msk.msra.mxu3 %vm310_vm0, %v294_v4 }
  0x2a   : > { %552 = vmatpush.xpose.msk.msra.mxu0 %vm310_vm0, %v293_v5  ;;  %575 = vmatpush.xpose.msk.msra.mxu3 %vm310_vm0, %v293_v5 }
  0x2e   : > { %553 = vmatpush.xpose.msk.msra.mxu0 %vm310_vm0, %v292_v6  ;;  %576 = vmatpush.xpose.msk.msra.mxu3 %vm310_vm0, %v292_v6 }
  0x32   : > { %554 = vmatpush.xpose.msk.msra.mxu0 %vm310_vm0, %v291_v7  ;;  %577 = vmatpush.xpose.msk.msra.mxu3 %vm310_vm0, %v291_v7 }
  0x36   : > { %555 = vmatpush.xpose.msk.msra.mxu0 %vm310_vm0, %v290_v8  ;;  %578 = vmatpush.xpose.msk.msra.mxu3 %vm310_vm0, %v290_v8 }
  0x3a   : > { %556 = vmatpush.xpose.msk.msra.mxu0 %vm310_vm0, %v289_v9  ;;  %579 = vmatpush.xpose.msk.msra.mxu3 %vm310_vm0, %v289_v9 }
  0x3e   : > { %557 = vmatpush.xpose.msk.msra.mxu0 %vm310_vm0, %v288_v11  ;;  %580 = vmatpush.xpose.msk.msra.mxu3 %vm310_vm0, %v288_v11 }
  0x42   : > { %558 = vmatpush.xpose.msk.msra.mxu0 %vm310_vm0, %v287_v13  ;;  %581 = vmatpush.xpose.msk.msra.mxu3 %vm310_vm0, %v287_v13 }
  0x46   : > { %559 = vmatpush.xpose.msk.msra.mxu0 %vm310_vm0, %v286_v15  ;;  %582 = vmatpush.xpose.msk.msra.mxu3 %vm310_vm0, %v286_v15 }
  0x4a   : > { %560 = vmatpush.xpose.msk.msra.mxu0 %vm310_vm0, %v285_v16  ;;  %583 = vmatpush.xpose.msk.msra.mxu3 %vm310_vm0, %v285_v16 }
  0x4e   : > { %561 = vmatpush.xpose.msk.msra.mxu0 %vm310_vm0, %v284_v17  ;;  %584 = vmatpush.xpose.msk.msra.mxu3 %vm310_vm0, %v284_v17 }
  0x52   : > { %562 = vmatpush.xpose.msk.msra.mxu0 %vm310_vm0, %v283_v18  ;;  %585 = vmatpush.xpose.msk.msra.mxu3 %vm310_vm0, %v283_v18 }
  0x56   : > { %563 = vmatpush.xpose.msk.msra.mxu0 %vm310_vm0, %v282_v19  ;;  %586 = vmatpush.xpose.msk.msra.mxu3 %vm310_vm0, %v282_v19 }
  0x59   : > { %564 = vmatmul.msk.f32.vlgmr.msra.gmra.mxu0 %vm310_vm0, %v280_v20  ;;  %565 = vmatmul.msk.f32.vlgmr.msra.gmra.mxu3 %vm310_vm0, %v281_v21 }
  0x8a   : > { %v308_v24 = vpop.permute.xlu0 %307 }
  0x8b   : > { %v395_v33 = vpop.permute.xlu1 %394 }
  0x92   : > { %v303_v25 = vpop.permute.xlu0 %302 }
  0x93   : > { %v427_v38 = vpop.permute.xlu1 %426 }
  0x94   : > { %v429_v39 = vperm.slane %v427_v38, 0 }
  0xd6   : > { %v382_v26 = vpop.f32.mrf.mxu0 }
  0xd7   : > { %v383_v28 = vadd.f32 %v382_v26, %v303_v25 }
  0xd9   : > { %v388_v31 = vmax.f32 %v383_v28, 0.0 }
  0xdc   : > { %v385_v27 = vpop.f32.mrf.mxu3 }
  0xdd   : > { %v386_v29 = vadd.f32 %v385_v27, %v308_v24 }
  0xdf   : > { %v389_v30 = vmax.f32 %v386_v29, 0.0 }
  0xe1   : > { %415 = vmatpush.msra.mxu1 %v389_v30 }
  0xe3   : > { %416 = vmatpush.msra.mxu1 %v388_v31 }
  0xe4   : > { %566 = vmatmul.msk.f32.vlgmr.msra.gmra.mxu1 %vm397_vm1, %v390_v32 }
 0x161   : > { %v418_v34 = vpop.f32.mrf.mxu1 }
 0x162   : > { %v419_v35 = vadd.f32 %v418_v34, %v395_v33 }
 0x164   : > { %v421_v36 = vmax.f32 %v419_v35, 0.0 }
 0x166   : > { %449 = vmatpush.msra.mxu2 %v421_v36 }
 0x167   : > { %567 = vmatmul.msk.f32.vlgmr.msra.gmra.mxu2 %vm430_vm2, %v422_v37 }
 0x1ea   : > { %v451_v40 = vpop.f32.mrf.mxu2 }
 0x1eb   : > { %v452_v41 = vadd.f32 %v451_v40, %v429_v39 }
 0x1ed   : > { %v568_v42 = vmul.f32 -1.442695, %v452_v41 }
 0x1ef   : > { %629 = vpow2.f32 %v568_v42 }
 0x1f5   : > { %v630_v43 = vpop.eup %629 }
 0x1f6   : > { %v457_v44 = vadd.f32 1.0, %v630_v43 }
 0x1f8   : > { %631 = vrcp.f32 %v457_v44  ;;  %v469_v48 = vand.u32 2147483648, %v457_v44  ;;  %v467_v50 = vand.u32 2147483647, %v457_v44  ;;  %vm463_vm4 = vweird.f32 %v457_v44 }
 0x1fa   : > { %v470_v52 = vor.u32 1.1754944e-38, %v469_v48  ;;  %vm468_vm6 = vcmp.eq.f32.partialorder %v467_v50, 8.507059e+37 }
 0x1fe   : > { %v632_v45 = vpop.eup %631 }
 0x1ff   : > { %v459_v46 = vmul.f32 %v632_v45, %v457_v44  ;;  %vm464_vm3 = vweird.f32 %v632_v45 }
 0x200   : > { %vm465_vm5 = vmor %vm463_vm4, %vm464_vm3 }
 0x201   : > { %v460_v47 = vsub.f32 1.0, %v459_v46 }
 0x203   : > { %v461_v49 = vmul.f32 %v632_v45, %v460_v47 }
 0x205   : > { %v462_v51 = vadd.f32 %v632_v45, %v461_v49 }
 0x207   : > { %v466_v53 = vsel %vm465_vm5, %v632_v45, %v462_v51 }
 0x208   : > { %v471_v54 = vsel %vm468_vm6, %v470_v52, %v466_v53 }
 0x209   : > { %473 = vst [vmem:[%s273_s22] sm:$0x1] %v471_v54 }
 0x20a   : > { %660 = shalt.err (!%p657_p3)
}
 0x20b   : > { %587 = dma.vmem_to_hbm [thread:$0]  (%p779_p5), %s486_s23, 16, %s488_s24, %s475_s25  }
 0x20c PF: > { %p593_p4 = scmp.ge.s32.totalorder %s695_s29, 2  ;;  %s499_s17 = sand.u32 1, %s683_s26  }
 0x20d   : > { %s500_s18 = scalar_lea.sflag [#allocation4], %s499_s17 }
 0x20e   : > { %p590_p7 = pnand %p593_p4, %p783_p6 }
 0x210   : > { %p591_p8 = pneg %p590_p7 }
 0x212   : > { %678 = dma.done.wait (%p591_p8), %s500_s18, 16  }
 0x213   : > { %680 = vsyncadd (%p591_p8), %s500_s18, 4294967280  ;;  %p19_p9 = scmp.ge.s32.totalorder %s766_s8, 4   ;;  %s908_s26 = smov %s687_s27 }
 0x214   : > { %s909_s27 = smov %s691_s28  ;;  %s910_s28 = smov %s777_s11 }
 0x215   : > { %s911_s29 = smov %s766_s8  ;;  %21 = sbr.rel (!%p19_p9) target bundleno = 6 (0x6), region = 83 }
 0x21a   :  { %505 = vsyncpa [#allocation4], 1 }
 0x21b   :  { %507 = vsyncpa [#allocation4 + $0x1], 1 }

</bundles_post_ra>
